<compile_context>
chip_gen: v7x
topology: tpu7x:2x2x1
jax: 0.10.0
libtpu: 0.0.40
codegen_flags: <defaults>
</compile_context>

<pallas_src>
import jax
import jax.numpy as jnp
from jax.experimental import pallas as pl
from jax.experimental.pallas import tpu as pltpu


IM_TARGET = 8  # IM*H = 128 conv rows per step (fills v5e MXU rows; good on v6e/v7x).
               # On v6e/v7x, 16 (256 rows) is also reasonable for very large B.


def _choose_im(batch, target=IM_TARGET):
    """Images packed per grid step; keep >=2 grid steps when possible (v7x: 2 TCs)."""
    if batch >= 2 * target:
        return target
    return max(1, batch // 2) if batch > 1 else 1


def _cascaded_kernel(x_ref, wcat_ref, bconv_ref, pool_ref,
                     pw1_ref, b1_ref, w2_ref, b2_ref, out_ref):
    # x_ref block: [1, IM*H, 3*(W+2)*Cin]  (IM ky-unrolled padded images)
    x = x_ref[0]                                                   # [IM*H, K]

    # 3x3 conv (padding=1) as a single aligned matmul + bias + ReLU
    conv = jnp.dot(x, wcat_ref[...], preferred_element_type=jnp.float32)
    conv = jnp.maximum(conv + bconv_ref[...], 0.0)                 # [IM*H, W*Cout]

    # Global average pool over rows (per image) via row-selection matmul
    # (1/(H*W) folded into pool_ref); lane-group fold + first Linear are fused
    # into pw1 in the wrapper.
    s = jnp.dot(pool_ref[...], conv, preferred_element_type=jnp.float32)   # [IM, W*Cout]
    h = jnp.dot(s, pw1_ref[...], preferred_element_type=jnp.float32) + b1_ref[...]
    h = jnp.maximum(h, 0.0)                                        # [IM, hidden]

    # Final Linear, lane-padded to n_pad=128
    out_ref[0] = (jnp.dot(h, w2_ref[...], preferred_element_type=jnp.float32)
                  + b2_ref[...])                                   # [IM, n_pad]


def prepare_weights(params, *, H, W):
    """One-time, per-parameter-set preprocessing (hoisted out of the forward path)."""
    wc, bc, w1, b1, w2, b2 = (params["wc"], params["bc"], params["w1"],
                              params["b1"], params["w2"], params["b2"])
    kh, kw, Cin, Cout = wc.shape
    assert (kh, kw) == (3, 3)
    hidden = w1.shape[1]
    n_cls = w2.shape[1]

    # Banded conv weights: wband[ky, a*Cin+ci, x*Cout+co] = wc[ky, a-x, ci, co]
    a_idx = jnp.arange(W + 2)[:, None]               # padded-col index
    x_idx = jnp.arange(W)[None, :]                   # output-col index
    sel = ((a_idx - x_idx)[None, :, :] ==
           jnp.arange(3)[:, None, None]).astype(jnp.float32)       # [3(kx), W+2, W]
    wband = jnp.einsum('kax,ykio->yaixo', sel, wc).reshape(
        3, (W + 2) * Cin, W * Cout)
    # ky-unrolled K layout -> single conv weight slab [3*(W+2)*Cin, W*Cout]
    wcat = wband.reshape(3 * (W + 2) * Cin, W * Cout)
    # VMEM guard: this slab is O(W^2) and double-buffered; v7x physical VMEM = 64 MiB.
    assert wcat.size * 4 <= 8 * 1024 * 1024, "banded conv weight too large for VMEM; tile W"

    # conv bias broadcast to the [x*Cout + co] lane layout
    bconv = jnp.tile(bc.reshape(1, Cout), (1, W))                   # [1, W*Cout]

    # lane-group average-pool folded into the first Linear: [W*Cout, hidden]
    pw1 = jnp.tile(jnp.eye(Cout, dtype=jnp.float32), (W, 1)) @ w1

    # lane-dense classifier output: pad num_classes up to a multiple of 128
    n_pad = ((n_cls + 127) // 128) * 128
    w2p = jnp.pad(w2, ((0, 0), (0, n_pad - n_cls)))
    b2p = jnp.pad(b2.reshape(1, n_cls), ((0, 0), (0, n_pad - n_cls)))

    return {"wcat": wcat, "bconv": bconv, "pw1": pw1,
            "b1": b1.reshape(1, hidden), "w2p": w2p, "b2p": b2p}


def cascaded_forward(x_nchw, params, prep=None, im_target=IM_TARGET):
    """x_nchw: [B, Cin, H, W] float32 (PyTorch layout). Returns [B, num_classes]."""
    B, Cin, H, W = x_nchw.shape
    if prep is None:
        prep = prepare_weights(params, H=H, W=W)
    wcat, bconv, pw1, b1r, w2p, b2p = (prep["wcat"], prep["bconv"], prep["pw1"],
                                       prep["b1"], prep["w2p"], prep["b2p"])
    kdim = wcat.shape[0]                 # 3*(W+2)*Cin
    wc_n = wcat.shape[1]                 # W*Cout
    hidden = pw1.shape[1]
    n_pad = w2p.shape[1]
    n_cls = params["w2"].shape[1]
    assert kdim == 3 * (W + 2) * Cin

    im = _choose_im(B, im_target)
    nblk = pl.cdiv(B, im)
    B_pad = nblk * im

    # ---- per-call activation glue (XLA): NCHW -> padded NHWC -> ky-unrolled rows
    x = jnp.transpose(x_nchw, (0, 2, 3, 1))                         # [B, H, W, Cin]
    xpad = jnp.pad(x, ((0, 0), (1, 1), (1, 1), (0, 0)))             # [B, H+2, W+2, Cin]
    x2 = xpad.reshape(B, H + 2, (W + 2) * Cin)                      # [B, H+2, (W+2)*Cin]
    xcat = jnp.concatenate([x2[:, 0:H, :], x2[:, 1:H + 1, :], x2[:, 2:H + 2, :]],
                           axis=-1)                                  # [B, H, 3*(W+2)*Cin]
    if B_pad != B:
        xcat = jnp.pad(xcat, ((0, B_pad - B), (0, 0), (0, 0)))
    x_blocks = xcat.reshape(nblk, im * H, kdim)                      # per-step LHS blocks

    # row-pool selection matrix (per-image mean over rows, 1/(H*W) folded in)
    pool = jnp.repeat(jnp.eye(im, dtype=jnp.float32), H, axis=1) / float(H * W)  # [im, im*H]

    out = pl.pallas_call(
        _cascaded_kernel,
        out_shape=jax.ShapeDtypeStruct((nblk, im, n_pad), jnp.float32),
        grid_spec=pltpu.PrefetchScalarGridSpec(
            num_scalar_prefetch=0,
            grid=(nblk,),
            in_specs=[
                pl.BlockSpec((1, im * H, kdim), lambda b: (b, 0, 0)),
                pl.BlockSpec((kdim, wc_n), lambda b: (0, 0)),
                pl.BlockSpec((1, wc_n), lambda b: (0, 0)),
                pl.BlockSpec((im, im * H), lambda b: (0, 0)),
                pl.BlockSpec((wc_n, hidden), lambda b: (0, 0)),
                pl.BlockSpec((1, hidden), lambda b: (0, 0)),
                pl.BlockSpec((hidden, n_pad), lambda b: (0, 0)),
                pl.BlockSpec((1, n_pad), lambda b: (0, 0)),
            ],
            out_specs=pl.BlockSpec((1, im, n_pad), lambda b: (b, 0, 0)),
        ),
        compiler_params=pltpu.CompilerParams(
            dimension_semantics=("parallel",),
            vmem_limit_bytes=32 * 1024 * 1024,
        ),
    )(x_blocks, wcat, bconv, pool, pw1, b1r, w2p, b2p)

    return out.reshape(B_pad, n_pad)[:B, :n_cls]


def _reference_forward(x_nchw, params):
    """Pure-JAX reference (lax.conv) mirroring the PyTorch module semantics."""
    wc, bc, w1, b1, w2, b2 = (params["wc"], params["bc"], params["w1"],
                              params["b1"], params["w2"], params["b2"])
    x = jnp.transpose(x_nchw, (0, 2, 3, 1))                          # NHWC
    conv = jax.lax.conv_general_dilated(
        x, wc, window_strides=(1, 1), padding="SAME",
        dimension_numbers=("NHWC", "HWIO", "NHWC"))
    conv = jnp.maximum(conv + bc.reshape(1, 1, 1, -1), 0.0)
    feat = jnp.mean(conv, axis=(1, 2))                               # [B, Cout]
    h = jnp.maximum(feat @ w1 + b1, 0.0)
    return h @ w2 + b2


def init_params(key, cin=4, cout=8, hidden=32, n_cls=10):
    ks = jax.random.split(key, 6)
    wc = jax.random.normal(ks[0], (3, 3, cin, cout), jnp.float32) * (1.0 / (3.0 * cin) ** 0.5)
    bc = jax.random.normal(ks[1], (1, cout), jnp.float32) * 0.01
    w1 = jax.random.normal(ks[2], (cout, hidden), jnp.float32) * (1.0 / cout ** 0.5)
    b1 = jax.random.normal(ks[3], (1, hidden), jnp.float32) * 0.01
    w2 = jax.random.normal(ks[4], (hidden, n_cls), jnp.float32) * (1.0 / hidden ** 0.5)
    b2 = jax.random.normal(ks[5], (1, n_cls), jnp.float32) * 0.01
    return {"wc": wc, "bc": bc, "w1": w1, "b1": b1, "w2": w2, "b2": b2}


if __name__ == "__main__":
    key = jax.random.PRNGKey(0)
    k_x, k_p, k_x2 = jax.random.split(key, 3)

    B, Cin, H, W = 2, 4, 16, 16
    x = jax.random.normal(k_x, (B, Cin, H, W), jnp.float32)
    params = init_params(k_p, cin=Cin)
    prep = prepare_weights(params, H=H, W=W)          # hoisted weight prep (reused below)

    out = cascaded_forward(x, params, prep)
    out = jax.block_until_ready(out)
    ref = _reference_forward(x, params)
    assert out.shape == (B, 10)
    assert jnp.allclose(out, ref, atol=1e-4, rtol=1e-4), "mismatch vs reference (B=2)"

    # Exercise the packed path: B=17 -> IM=8, grid of 3 steps, batch padded to 24.
    xb = jax.random.normal(k_x2, (17, Cin, H, W), jnp.float32)
    outb = jax.block_until_ready(cascaded_forward(xb, params, prep))
    refb = _reference_forward(xb, params)
    assert outb.shape == (17, 10)
    assert jnp.allclose(outb, refb, atol=1e-4, rtol=1e-4), "mismatch vs reference (B=17)"

    print("KERNEL_OK")
</pallas_src>

<mosaic_0001>
module attributes {stable_mosaic.version = 11 : i64} {
  func.func @_cascaded_kernel(%arg0: i32, %arg1: memref<1x16x216xf32, #tpu.memory_space<vmem>>, %arg2: memref<216x128xf32, #tpu.memory_space<vmem>>, %arg3: memref<1x128xf32, #tpu.memory_space<vmem>>, %arg4: memref<1x16xf32, #tpu.memory_space<vmem>>, %arg5: memref<128x32xf32, #tpu.memory_space<vmem>>, %arg6: memref<1x32xf32, #tpu.memory_space<vmem>>, %arg7: memref<32x128xf32, #tpu.memory_space<vmem>>, %arg8: memref<1x128xf32, #tpu.memory_space<vmem>>, %arg9: memref<1x1x128xf32, #tpu.memory_space<vmem>>) attributes {dimension_semantics = [#tpu.dimension_semantics<parallel>], iteration_bounds = array<i64: 2>, scalar_prefetch = 0 : i64, scratch_operands = 0 : i64, tpu.core_type = #tpu.core_type<tc>, window_params = [{transform_indices = @transform_0, window_bounds = array<i64: 1, 16, 216>}, {pipeline_mode = #tpu.pipeline_mode<synchronous>, transform_indices = @transform_1, window_bounds = array<i64: 216, 128>}, {pipeline_mode = #tpu.pipeline_mode<synchronous>, transform_indices = @transform_2, window_bounds = array<i64: 1, 128>}, {pipeline_mode = #tpu.pipeline_mode<synchronous>, transform_indices = @transform_3, window_bounds = array<i64: 1, 16>}, {pipeline_mode = #tpu.pipeline_mode<synchronous>, transform_indices = @transform_4, window_bounds = array<i64: 128, 32>}, {pipeline_mode = #tpu.pipeline_mode<synchronous>, transform_indices = @transform_5, window_bounds = array<i64: 1, 32>}, {pipeline_mode = #tpu.pipeline_mode<synchronous>, transform_indices = @transform_6, window_bounds = array<i64: 32, 128>}, {pipeline_mode = #tpu.pipeline_mode<synchronous>, transform_indices = @transform_7, window_bounds = array<i64: 1, 128>}, {transform_indices = @transform_8, window_bounds = array<i64: 1, 1, 128>}]} {
    %c0 = arith.constant 0 : index
    %c0_0 = arith.constant 0 : index
    %c0_1 = arith.constant 0 : index
    %0 = vector.load %arg1[%c0, %c0_0, %c0_1] : memref<1x16x216xf32, #tpu.memory_space<vmem>>, vector<1x16x216xf32>
    %1 = vector.shape_cast %0 : vector<1x16x216xf32> to vector<16x216xf32>
    %c0_2 = arith.constant 0 : index
    %c0_3 = arith.constant 0 : index
    %2 = vector.load %arg2[%c0_2, %c0_3] : memref<216x128xf32, #tpu.memory_space<vmem>>, vector<216x128xf32>
    %cst = arith.constant dense<0.000000e+00> : vector<16x128xf32>
    %3 = tpu.matmul %1, %2, %cst {dimension_numbers = #tpu.dot_dimension_numbers<[1], [0], [0], [1], [0, 0, 1, 1], [], []>} : vector<16x216xf32>, vector<216x128xf32>, vector<16x128xf32> -> vector<16x128xf32>
    %c0_4 = arith.constant 0 : index
    %c0_5 = arith.constant 0 : index
    %4 = vector.load %arg3[%c0_4, %c0_5] : memref<1x128xf32, #tpu.memory_space<vmem>>, vector<1x128xf32>
    %5 = vector.broadcast %4 : vector<1x128xf32> to vector<16x128xf32>
    %6 = arith.addf %3, %5 : vector<16x128xf32>
    %cst_6 = arith.constant 0.000000e+00 : f32
    %7 = vector.broadcast %cst_6 : f32 to vector<16x128xf32>
    %8 = arith.maximumf %6, %7 : vector<16x128xf32>
    %c0_7 = arith.constant 0 : index
    %c0_8 = arith.constant 0 : index
    %9 = vector.load %arg4[%c0_7, %c0_8] : memref<1x16xf32, #tpu.memory_space<vmem>>, vector<1x16xf32>
    %cst_9 = arith.constant dense<0.000000e+00> : vector<1x128xf32>
    %10 = tpu.matmul %9, %8, %cst_9 {dimension_numbers = #tpu.dot_dimension_numbers<[1], [0], [0], [1], [0, 0, 1, 1], [], []>} : vector<1x16xf32>, vector<16x128xf32>, vector<1x128xf32> -> vector<1x128xf32>
    %c0_10 = arith.constant 0 : index
    %c0_11 = arith.constant 0 : index
    %11 = vector.load %arg5[%c0_10, %c0_11] : memref<128x32xf32, #tpu.memory_space<vmem>>, vector<128x32xf32>
    %cst_12 = arith.constant dense<0.000000e+00> : vector<1x32xf32>
    %12 = tpu.matmul %10, %11, %cst_12 {dimension_numbers = #tpu.dot_dimension_numbers<[1], [0], [0], [1], [0, 0, 1, 1], [], []>} : vector<1x128xf32>, vector<128x32xf32>, vector<1x32xf32> -> vector<1x32xf32>
    %c0_13 = arith.constant 0 : index
    %c0_14 = arith.constant 0 : index
    %13 = vector.load %arg6[%c0_13, %c0_14] : memref<1x32xf32, #tpu.memory_space<vmem>>, vector<1x32xf32>
    %14 = arith.addf %12, %13 : vector<1x32xf32>
    %cst_15 = arith.constant 0.000000e+00 : f32
    %15 = vector.broadcast %cst_15 : f32 to vector<1x32xf32>
    %16 = arith.maximumf %14, %15 : vector<1x32xf32>
    %c0_16 = arith.constant 0 : index
    %c0_17 = arith.constant 0 : index
    %17 = vector.load %arg7[%c0_16, %c0_17] : memref<32x128xf32, #tpu.memory_space<vmem>>, vector<32x128xf32>
    %cst_18 = arith.constant dense<0.000000e+00> : vector<1x128xf32>
    %18 = tpu.matmul %16, %17, %cst_18 {dimension_numbers = #tpu.dot_dimension_numbers<[1], [0], [0], [1], [0, 0, 1, 1], [], []>} : vector<1x32xf32>, vector<32x128xf32>, vector<1x128xf32> -> vector<1x128xf32>
    %c0_19 = arith.constant 0 : index
    %c0_20 = arith.constant 0 : index
    %19 = vector.load %arg8[%c0_19, %c0_20] : memref<1x128xf32, #tpu.memory_space<vmem>>, vector<1x128xf32>
    %20 = arith.addf %18, %19 : vector<1x128xf32>
    %c0_21 = arith.constant 0 : index
    %c0_22 = arith.constant 0 : index
    %c0_23 = arith.constant 0 : index
    %21 = vector.load %arg9[%c0_21, %c0_22, %c0_23] : memref<1x1x128xf32, #tpu.memory_space<vmem>>, vector<1x1x128xf32>
    %22 = vector.shape_cast %21 : vector<1x1x128xf32> to vector<1x128xf32>
    %23 = vector.shape_cast %20 : vector<1x128xf32> to vector<1x1x128xf32>
    tpu.vector_store %arg9[%c0_21, %c0_22, %c0_23], %23 {strides = array<i32>} : memref<1x1x128xf32, #tpu.memory_space<vmem>>, vector<1x1x128xf32>,
    return
  }
  func.func @transform_0(%arg0: i32) -> (i32, i32, i32) {
    %c0_i32 = arith.constant 0 : i32
    %c0_i32_0 = arith.constant 0 : i32
    %c0_i32_1 = arith.constant 0 : i32
    return %arg0, %c0_i32, %c0_i32_0 : i32, i32, i32
  }
  func.func @transform_1(%arg0: i32) -> (i32, i32) {
    %c0_i32 = arith.constant 0 : i32
    %c0_i32_0 = arith.constant 0 : i32
    %c0_i32_1 = arith.constant 0 : i32
    return %c0_i32, %c0_i32_0 : i32, i32
  }
  func.func @transform_2(%arg0: i32) -> (i32, i32) {
    %c0_i32 = arith.constant 0 : i32
    %c0_i32_0 = arith.constant 0 : i32
    %c0_i32_1 = arith.constant 0 : i32
    return %c0_i32, %c0_i32_0 : i32, i32
  }
  func.func @transform_3(%arg0: i32) -> (i32, i32) {
    %c0_i32 = arith.constant 0 : i32
    %c0_i32_0 = arith.constant 0 : i32
    %c0_i32_1 = arith.constant 0 : i32
    return %c0_i32, %c0_i32_0 : i32, i32
  }
  func.func @transform_4(%arg0: i32) -> (i32, i32) {
    %c0_i32 = arith.constant 0 : i32
    %c0_i32_0 = arith.constant 0 : i32
    %c0_i32_1 = arith.constant 0 : i32
    return %c0_i32, %c0_i32_0 : i32, i32
  }
  func.func @transform_5(%arg0: i32) -> (i32, i32) {
    %c0_i32 = arith.constant 0 : i32
    %c0_i32_0 = arith.constant 0 : i32
    %c0_i32_1 = arith.constant 0 : i32
    return %c0_i32, %c0_i32_0 : i32, i32
  }
  func.func @transform_6(%arg0: i32) -> (i32, i32) {
    %c0_i32 = arith.constant 0 : i32
    %c0_i32_0 = arith.constant 0 : i32
    %c0_i32_1 = arith.constant 0 : i32
    return %c0_i32, %c0_i32_0 : i32, i32
  }
  func.func @transform_7(%arg0: i32) -> (i32, i32) {
    %c0_i32 = arith.constant 0 : i32
    %c0_i32_0 = arith.constant 0 : i32
    %c0_i32_1 = arith.constant 0 : i32
    return %c0_i32, %c0_i32_0 : i32, i32
  }
  func.func @transform_8(%arg0: i32) -> (i32, i32, i32) {
    %c0_i32 = arith.constant 0 : i32
    %c0_i32_0 = arith.constant 0 : i32
    %c0_i32_1 = arith.constant 0 : i32
    return %arg0, %c0_i32, %c0_i32_0 : i32, i32, i32
  }
}

</mosaic_0001>

<bundles_post_ra>
// kernel: tpu_custom_call.1
= control target key start
LH: loop header
LB: loop body
LE: loop exit
PB: predicated region body
PF: predicated region fallthrough
CT: control target
= control target key end

     0   :  { %13 = vsyncpa [#allocation3], 0  ;;  %s1379_s0 = inlined_call_operand.vmem [shape: f32[2,16,216], index: 0, kind: input, shape index: {}]   ;;  %s1380_s1 = inlined_call_operand.hbm [shape: f32[216,128], index: 1, kind: input, shape index: {}]   ;;  %s1381_s2 = inlined_call_operand.vmem [shape: f32[1,128], index: 2, kind: input, shape index: {}]   ;;  %s1382_s3 = inlined_call_operand.vmem [shape: f32[1,16], index: 3, kind: input, shape index: {}]   ;;  %s1383_s4 = inlined_call_operand.vmem [shape: f32[128,32], index: 4, kind: input, shape index: {}]   ;;  %s1384_s5 = inlined_call_operand.vmem [shape: f32[1,32], index: 5, kind: input, shape index: {}]   ;;  %s1385_s6 = inlined_call_operand.vmem [shape: f32[32,128], index: 6, kind: input, shape index: {}]   ;;  %s1386_s7 = inlined_call_operand.vmem [shape: f32[1,128], index: 7, kind: input, shape index: {}]   ;;  %s1387_s8 = inlined_call_operand.hbm [shape: f32[2,1,128], index: 8, kind: output, shape index: {}]  }
   0x1   :  { %14 = vsyncpa [#allocation4], 0 }
   0x2   :  { %16 = vsyncpa [#allocation4 + $0x1], 0  ;;  %s1133_s27 = smov 0   ;;  %s1135_s28 = smov 0  }
   0x3   :  { %s1137_s29 = smov 0   ;;  %s1139_s30 = smov 0  }
   0x4 LB: > { %s1154_s9 = sadd.s32 4294967295, %s1079_s30   ;;  %s763_s10 = sadd.s32 4294967294, %s1079_s30   ;;  %s1079_s30 = sphi %s1139_s30, %s1403_s30   ;;  %s1075_s29 = sphi %s1137_s29, %s1402_s29   ;;  %s1071_s28 = sphi %s1135_s28, %s1401_s28   ;;  %s1067_s27 = sphi %s1133_s27, %s1400_s27  }
   0x5   : > { %s1158_s11 = sadd.s32 1, %s1079_s30   ;;  %s202_s12 = sadd.s32 1, %s1075_s29 }
   0x6   : > { %s199_s13 = ssub.s32 %s1079_s30, %s1158_s11  ;;  %p212_p0 = scmp.ne.s32.totalorder %s1075_s29, %s1071_s28 }
   0x7   : > { %p200_p1 = scmp.eq.s32.totalorder %s199_s13, 0  ;;  %p213_p2 = scmp.eq.s32.totalorder %s1154_s9, 1 }
   0x8   : > { %p218_p3 = scmp.ne.s32.totalorder %s1071_s28, %s1067_s27  ;;  %p219_p4 = scmp.eq.s32.totalorder %s763_s10, 1 }
   0x9   : > { %s1169_s14 = scalar_select %p200_p1, %s1075_s29, %s202_s12  }
   0xa   : > { %p1171_p5 = por %p213_p2, %p212_p0  ;;  %p1175_p6 = por %p219_p4, %p218_p3 }
   0xb   : > { %p764_p7 = scmp.ge.s32.totalorder %s1079_s30, 1  ;;  %p226_p8 = scmp.lt.s32.totalorder %s1079_s30, 3 }
   0xc   : > { %s1391_s15 = scalar_select %p1171_p5, 1, 0 }
   0xd   : > { %s1392_s16 = scalar_select %p1175_p6, 1, 0 }
   0xe   : > { %p1388_p9 = scmp.eq.s32.totalorder %s1154_s9, 0  ;;  %p1182_p10 = pnand %p764_p7, %p226_p8 }
   0xf   : > { %s1081_s18 = smov [#allocation2]   ;;  %s985_s23 = scalar_lea.hbm %s1380_s1, 3456 }
  0x10   : > { %s1393_s17 = scalar_select %p1182_p10, 1, 0 }
  0x11   : > { %s238_s19 = sshll.u32 %s1081_s18, 4  ;;  %p936_p11 = pneg %p1182_p10  ;;  %s239_s19 = int_to_ptr.vmem [resolvable:$true] %s238_s19 }
  0x12   : > { %p986_p13 = scmp.ne.s32.totalorder %s1380_s1, %s985_s23  ;;  %p992_p3 = scmp.lt.u32.totalorder %s985_s23, %s1380_s1 }
  0x13   : > { %p1190_p12 = pnand %p1388_p9, %p936_p11 }
  0x15   : > { %p987_p0 = pneg %p1190_p12 }
  0x17   : > { %p988_p1 = pnand %p987_p0, %p986_p13 }
  0x19   : > { %p989_p2 = pneg %p988_p1 }
  0x1b   : > { %p994_p4 = pnand %p992_p3, %p989_p2 }
  0x1d   : > { %997 = shalt.err (!%p994_p4)
}
  0x1e   : > { %s998_s12 = scalar_lea.vmem %s239_s19, 3456  ;;  %p1006_p9 = scmp.lt.s32.totalorder %s239_s19, %s239_s19 }
  0x1f   : > { %p999_p7 = scmp.ne.s32.totalorder %s239_s19, %s998_s12  ;;  %p1007_p6 = scmp.lt.s32.totalorder %s998_s12, %s998_s12 }
  0x21   : > { %p1001_p8 = pnand %p999_p7, %p987_p0  ;;  %p1008_p5 = por %p1007_p6, %p1006_p9 }
  0x23   : > { %p1002_p11 = pneg %p1001_p8 }
  0x25   : > { %p1009_p10 = pnand %p1008_p5, %p1002_p11 }
  0x27   : > { %1012 = shalt.err (!%p1009_p10)
}
  0x28   : > { %s1082_s13 = smov 128   ;;  %s1083_s18 = smov 8  }
  0x29   : > { %939 = dma.hbm_to_vmem [thread:$0]  (!%p1190_p12), %s1380_s1, 3456, %s239_s19, [#allocation3], %s1082_s13, %s1082_s13, %s1083_s18  }
  0x2a   : > { %p1395_p13 = scmp.ne.s32.totalorder %s1393_s17, 0 }
  0x2b   : > { %p1396_p1 = scmp.eq.s32.totalorder (!%p1395_p13), %s1154_s9, 0 }
  0x2c   : > { %280 = sbr.rel (%p1395_p13) target bundleno = 989 (0x3dd), region = 52 }
  0x33   : > { %1058 = dma.done.wait (%p1396_p1), [#allocation3], 3456   ;;  %p1397_p0 = pmov %p1396_p1 }
  0x34   : > { %v1084_v0 = vmov 0.0|0.0   ;;  %p313_p5 = scmp.lt.s32.totalorder %s1154_s9, 1  ;;  %v322_v1 = vld [vmem:[#allocation2] sm:$0xff]  ;;  %v323_v2 = vld [vmem:[#allocation2 + $0x8] sm:$0xff]  ;;  %v324_v3 = vld [vmem:[#allocation2 + $0x10] sm:$0xff]  ;;  %vm356_vm0 = vcmask 719872  }
  0x35   : > { %1060 = vsyncadd (%p1397_p0), [#allocation3], 4294963840  ;;  %858 = vmatprep.subr.bf16.mxu0 %v1084_v0  ;;  %897 = vmatprep.subr.bf16.mxu1 %v1084_v0  ;;  %v859_v4 = vpack.c.bf16 %v323_v2, %v322_v1  ;;  %v325_v5 = vld [vmem:[#allocation2 + $0x18] sm:$0xff]  ;;  %v326_v7 = vld [vmem:[#allocation2 + $0x20] sm:$0xff]  ;;  %v1085_v41 = vmov 0.0   ;;  %vm1086_vm1 = vmmov 0  }
  0x36   : > { %s314_s20 = scalar_select %p313_p5, %s1154_s9, 1  ;;  %v862_v6 = vpack.c.bf16 %v325_v5, %v324_v3  ;;  %v327_v8 = vld [vmem:[#allocation2 + $0x28] sm:$0xff]  ;;  %v328_v10 = vld [vmem:[#allocation2 + $0x30] sm:$0xff]  ;;  %v329_v11 = vld [vmem:[#allocation2 + $0x38] sm:$0xff]  ;;  %809 = vmatprep.mubr.msk.f32.mxu1 %vm1086_vm1, %v1085_v41  ;;  %vm441_vm2 = vcmask 130048   ;;  %vm608_vm3 = vcmask 261120  }
  0x37   : > { %860 = vmatpush1.bf16.msra.mxu0 %v859_v4  ;;  %v865_v9 = vpack.c.bf16 %v327_v8, %v326_v7  ;;  %v868_v13 = vpack.c.bf16 %v329_v11, %v328_v10  ;;  %v330_v14 = vld [vmem:[#allocation2 + $0x40] sm:$0xff]  ;;  %v331_v15 = vld [vmem:[#allocation2 + $0x48] sm:$0xff]  ;;  %v332_v17 = vld [vmem:[#allocation2 + $0x50] sm:$0xff]  ;;  %s311_s22 = sand.u32 1, %s1071_s28   ;;  %s776_s19 = sshll.u32 %s1154_s9, 4 }
  0x38   : > { %s779_s17 = sshll.u32 %s314_s20, 5  ;;  %861 = vmatprep.subr.bf16.mxu0 %v1084_v0  ;;  %v871_v16 = vpack.c.bf16 %v331_v15, %v330_v14  ;;  %v333_v18 = vld [vmem:[#allocation2 + $0x58] sm:$0xff]  ;;  %v334_v20 = vld [vmem:[#allocation2 + $0x60] sm:$0xff]  ;;  %v335_v21 = vld [vmem:[#allocation2 + $0x68] sm:$0xff]  ;;  %s312_s23 = scalar_lea.vmem [#allocation5], %s311_s22 }
  0x39   : > { %s1224_s24 = scalar_lea.vmem %s1379_s0, %s779_s17  ;;  %v874_v19 = vpack.c.bf16 %v333_v18, %v332_v17  ;;  %v877_v22 = vpack.c.bf16 %v335_v21, %v334_v20  ;;  %v336_v23 = vld [vmem:[#allocation2 + $0x70] sm:$0xff]  ;;  %v337_v24 = vld [vmem:[#allocation2 + $0x78] sm:$0xff]  ;;  %v338_v26 = vld [vmem:[#allocation2 + $0x80] sm:$0xff]  ;;  %s1337_s10 = scalar_lea.hbm %s1387_s8, %s776_s19 }
  0x3a   : > { %v319_v12 = vld [vmem:[%s1224_s24 + $0x8] sm:$0xff]  ;;  %v880_v25 = vpack.c.bf16 %v337_v24, %v336_v23  ;;  %v340_v29 = vld [vmem:[#allocation2 + $0x90] sm:$0xff]  ;;  %v341_v30 = vld [vmem:[#allocation2 + $0x98] sm:$0xff]  ;;  %s684_s12 = scalar_lea.sflag [#allocation4], %s311_s22  ;;  %p1398_p9 = scmp.ne.s32.totalorder %s1391_s15, 0 }
  0x3b   : > { %863 = vmatpush1.bf16.msra.mxu0 %v862_v6  ;;  %772 = vmatprep.mubr.msk.f32.mxu0 %vm356_vm0, %v319_v12  ;;  %v339_v27 = vld [vmem:[#allocation2 + $0x88] sm:$0xff]  ;;  %v886_v31 = vpack.c.bf16 %v341_v30, %v340_v29  ;;  %v342_v32 = vld [vmem:[#allocation2 + $0xa0] sm:$0xff]  ;;  %v344_v35 = vld [vmem:[#allocation2 + $0xb0] sm:$0xff]  ;;  %s1087_s9 = smov [#allocation5]  }
  0x3c   : > { %864 = vmatprep.subr.bf16.mxu0 %v1084_v0  ;;  %v883_v28 = vpack.c.bf16 %v339_v27, %v338_v26  ;;  %v343_v33 = vld [vmem:[#allocation2 + $0xa8] sm:$0xff]  ;;  %v345_v36 = vld [vmem:[#allocation2 + $0xb8] sm:$0xff]  ;;  %v346_v38 = vld [vmem:[#allocation2 + $0xc0] sm:$0xff]  ;;  %s1017_s18 = sshll.u32 %s1087_s9, 4  ;;  %s1018_s18 = int_to_ptr.vmem [resolvable:$false] %s1017_s18 }
  0x3d   : > { %v889_v34 = vpack.c.bf16 %v343_v33, %v342_v32  ;;  %v892_v37 = vpack.c.bf16 %v345_v36, %v344_v35  ;;  %v347_v39 = vld [vmem:[#allocation2 + $0xc8] sm:$0xff]  ;;  %v348_v42 = vld [vmem:[#allocation2 + $0xd0] sm:$0xff]  ;;  %v318_v43 = vld [vmem:[%s1224_s24] sm:$0xff]  ;;  %s1019_s21 = scalar_lea.vmem %s1018_s18, 32 }
  0x3e   : > { %v895_v40 = vpack.c.bf16 %v347_v39, %v346_v38  ;;  %v321_v44 = vld [vmem:[%s1224_s24 + $0x18] sm:$0xff]  ;;  %v320_v45 = vld [vmem:[%s1224_s24 + $0x10] sm:$0xff]  ;;  %v771_v46 = vld [vmem:[%s1381_s2] ss:$0 sm:$0xff]  ;;  %s696_s24 = sshll.u32 %s312_s23, 4  ;;  %s1339_s24 = int_to_ptr.vmem [resolvable:$true] %s696_s24 }
  0x3f   : > { %866 = vmatpush1.bf16.msra.mxu0 %v865_v9  ;;  %v515_v55 = vld [vmem:[%s1383_s4] sm:$0xff]  ;;  %v516_v56 = vld [vmem:[%s1383_s4 + $0x8] sm:$0xff]  ;;  %v517_v60 = vld [vmem:[%s1383_s4 + $0x10] sm:$0xff]  ;;  %s1013_s13 = scalar_lea.vmem %s1339_s24, 16  ;;  %p1020_p2 = scmp.lt.s32.totalorder %s1339_s24, %s1018_s18 }
  0x40   : > { %867 = vmatprep.subr.bf16.mxu0 %v1084_v0  ;;  %v440_v58 = vld [vmem:[%s1382_s3] sm:$0x1]  ;;  %v901_v59 = vpack.c.bf16 %v516_v56, %v515_v55  ;;  %v518_v61 = vld [vmem:[%s1383_s4 + $0x18] sm:$0xff]  ;;  %v520_v1 = vld [vmem:[%s1383_s4 + $0x28] sm:$0xff]  ;;  %p1014_p6 = scmp.ne.s32.totalorder %s1339_s24, %s1013_s13  ;;  %p1021_p3 = scmp.lt.s32.totalorder %s1019_s21, %s1013_s13 }
  0x41   : > { %v904_v62 = vpack.c.bf16 %v518_v61, %v517_v60  ;;  %v519_v63 = vld [vmem:[%s1383_s4 + $0x20] sm:$0xff]  ;;  %v521_v3 = vld [vmem:[%s1383_s4 + $0x30] sm:$0xff]  ;;  %v522_v4 = vld [vmem:[%s1383_s4 + $0x38] sm:$0xff] }
  0x42   : > { %v907_v2 = vpack.c.bf16 %v520_v1, %v519_v63  ;;  %v910_v5 = vpack.c.bf16 %v522_v4, %v521_v3  ;;  %v523_v6 = vld [vmem:[%s1383_s4 + $0x40] sm:$0xff]  ;;  %v524_v7 = vld [vmem:[%s1383_s4 + $0x48] sm:$0xff]  ;;  %v525_v9 = vld [vmem:[%s1383_s4 + $0x50] sm:$0xff]  ;;  %p1015_p10 = pnand %p1014_p6, %p1398_p9  ;;  %p1022_p4 = por %p1021_p3, %p1020_p2 }
  0x43   : > { %869 = vmatpush1.bf16.msra.mxu0 %v868_v13  ;;  %v913_v8 = vpack.c.bf16 %v524_v7, %v523_v6  ;;  %v526_v10 = vld [vmem:[%s1383_s4 + $0x58] sm:$0xff]  ;;  %v527_v12 = vld [vmem:[%s1383_s4 + $0x60] sm:$0xff]  ;;  %v528_v13 = vld [vmem:[%s1383_s4 + $0x68] sm:$0xff] }
  0x44   : > { %870 = vmatprep.subr.bf16.mxu0 %v1084_v0  ;;  %v916_v11 = vpack.c.bf16 %v526_v10, %v525_v9  ;;  %v919_v14 = vpack.c.bf16 %v528_v13, %v527_v12  ;;  %v529_v15 = vld [vmem:[%s1383_s4 + $0x70] sm:$0xff]  ;;  %v603_v18 = vld [vmem:[%s1385_s6] sm:$0xff]  ;;  %v606_v24 = vld [vmem:[%s1385_s6 + $0x18] sm:$0xff]  ;;  %p1016_p12 = pneg %p1015_p10 }
  0x45   : > { %v605_v23 = vld [vmem:[%s1385_s6 + $0x10] sm:$0xff]  ;;  %v531_v26 = vld [vmem:[%s1384_s5] sm:$0x1] }
  0x46   : > { %p1023_p7 = pnand %p1022_p4, %p1016_p12 }
  0x47   : > { %872 = vmatpush1.bf16.msra.mxu0 %v871_v16  ;;  %v530_v16 = vld [vmem:[%s1383_s4 + $0x78] sm:$0xff] }
  0x48   : > { %873 = vmatprep.subr.bf16.mxu0 %v1084_v0  ;;  %v922_v17 = vpack.c.bf16 %v530_v16, %v529_v15 }
  0x4b   : > { %875 = vmatpush1.bf16.msra.mxu0 %v874_v19  ;;  %v604_v19 = vld [vmem:[%s1385_s6 + $0x8] sm:$0xff] }
  0x4c   : > { %876 = vmatprep.subr.bf16.mxu0 %v1084_v0  ;;  %v925_v20 = vpack.c.bf16 %v604_v19, %v603_v18 }
  0x4f   : > { %878 = vmatpush1.bf16.msra.mxu0 %v877_v22 }
  0x50   : > { %879 = vmatprep.subr.bf16.mxu0 %v1084_v0 }
  0x53   : > { %881 = vmatpush1.bf16.msra.mxu0 %v880_v25  ;;  %v928_v25 = vpack.c.bf16 %v606_v24, %v605_v23 }
  0x54   : > { %882 = vmatprep.subr.bf16.mxu0 %v1084_v0 }
  0x57   : > { %884 = vmatpush1.bf16.msra.mxu0 %v883_v28 }
  0x58   : > { %885 = vmatprep.subr.bf16.mxu0 %v1084_v0 }
  0x5b   : > { %887 = vmatpush1.bf16.msra.mxu0 %v886_v31 }
  0x5c   : > { %888 = vmatprep.subr.bf16.mxu0 %v1084_v0 }
  0x5f   : > { %890 = vmatpush1.bf16.msra.mxu0 %v889_v34 }
  0x60   : > { %891 = vmatprep.subr.bf16.mxu0 %v1084_v0 }
  0x63   : > { %893 = vmatpush1.bf16.msra.mxu0 %v892_v37 }
  0x64   : > { %894 = vmatprep.subr.bf16.mxu0 %v1084_v0 }
  0x67   : > { %896 = vmatpush1.bf16.msra.mxu0 %v895_v40 }
  0x68   : > { %415 = vmatprep.subr.mxu0 %v1085_v41 }
  0x6b   : > { %416 = vmatpush1.msra.mxu0 %v348_v42 }
  0x6c   : > { %428 = vmatmul.mubr.f32.vlgmr.msra.gmra.mrb[0].mxu0 %v318_v43 }
  0x6d   : > { %773 = vmatprep.mubr.msk.f32.mxu0 %vm356_vm0, %v321_v44 }
  0x70   : > { %433 = vmatmul.mubr.f32.gmra.mrb[2].mxu0 %v320_v45 }
 0x13f   : > { %v429_v47 = vpop.f32.mrb[0].mxu0 }
 0x140   : > { %v431_v48 = vpop.f32.mrb[1].mxu0  ;;  %v430_v49 = vadd.f32 %v771_v46, %v429_v47 }
 0x142   : > { %v438_v53 = vmax.f32 %v430_v49, 0.0 }
 0x143   : > { %v434_v50 = vpop.f32.mrb[2].mxu0 }
 0x144   : > { %v435_v51 = vadd.f32 %v771_v46, %v434_v50  ;;  %v436_v52 = vpop.f32.mrb[3].mxu0 }
 0x146   : > { %v439_v54 = vmax.f32 %v435_v51, 0.0 }
 0x148   : > { %v898_v57 = vpack.c.bf16 %v439_v54, %v438_v53 }
 0x14a   : > { %899 = vmatpush3.bf16.msra.mxu1 %v898_v57 }
 0x14b   : > { %900 = vmatprep.subr.bf16.mxu1 %v1084_v0 }
 0x14d   : > { %810 = vmatmul.mubr.msk.f32.vlgmr.msra.gmra.mrb[0].mxu1 %vm441_vm2, %v440_v58 }
 0x14e   : > { %902 = vmatpush3.bf16.msra.mxu1 %v901_v59  ;;  %844 = vmatprep.mubr.msk.f32.mxu1 %vm1086_vm1, %v1085_v41 }
 0x14f   : > { %903 = vmatprep.subr.bf16.mxu1 %v1084_v0 }
 0x152   : > { %905 = vmatpush3.bf16.msra.mxu1 %v904_v62 }
 0x153   : > { %906 = vmatprep.subr.bf16.mxu1 %v1084_v0 }
 0x156   : > { %908 = vmatpush3.bf16.msra.mxu1 %v907_v2 }
 0x157   : > { %909 = vmatprep.subr.bf16.mxu1 %v1084_v0 }
 0x15a   : > { %911 = vmatpush3.bf16.msra.mxu1 %v910_v5 }
 0x15b   : > { %912 = vmatprep.subr.bf16.mxu1 %v1084_v0 }
 0x15e   : > { %914 = vmatpush3.bf16.msra.mxu1 %v913_v8 }
 0x15f   : > { %915 = vmatprep.subr.bf16.mxu1 %v1084_v0 }
 0x162   : > { %917 = vmatpush3.bf16.msra.mxu1 %v916_v11 }
 0x163   : > { %918 = vmatprep.subr.bf16.mxu1 %v1084_v0 }
 0x166   : > { %920 = vmatpush3.bf16.msra.mxu1 %v919_v14 }
 0x167   : > { %921 = vmatprep.subr.bf16.mxu1 %v1084_v0 }
 0x16a   : > { %923 = vmatpush3.bf16.msra.mxu1 %v922_v17 }
 0x16b   : > { %924 = vmatprep.subr.bf16.mxu1 %v1084_v0 }
 0x220   : > { %v511_v21 = vpop.f32.mrb[0].mxu1 }
 0x221   : > { %v811_v22 = vpop.f32.mrb[1].mxu1  ;;  %845 = vmatmul.mubr.f32.vlgmr.msra.gmra.mrb[2].mxu1 %v511_v21 }
 0x222   : > { %926 = vmatpush3.bf16.msra.mxu1 %v925_v20  ;;  %855 = vmatprep.mubr.msk.f32.mxu1 %vm1086_vm1, %v1085_v41 }
 0x223   : > { %927 = vmatprep.subr.bf16.mxu1 %v1084_v0  ;;  %v607_v0 = vld [vmem:[%s1386_s7] sm:$0x1] }
 0x226   : > { %929 = vmatpush3.bf16.msra.mxu1 %v928_v25 }
 0x2f4   : > { %v598_v27 = vpop.f32.mrb[2].mxu1 }
 0x2f5   : > { %v599_v28 = vadd.f32 %v598_v27, %v531_v26  ;;  %v846_v29 = vpop.f32.mrb[3].mxu1 }
 0x2f7   : > { %v602_v30 = vmax.f32 %v599_v28, 0.0 }
 0x2f9   : > { %856 = vmatmul.mubr.msk.f32.vlgmr.msra.gmra.mrb[4].mxu1 %vm608_vm3, %v602_v30 }
 0x3cc   : > { %v678_v31 = vpop.f32.mrb[4].mxu1 }
 0x3cd   : > { %v679_v32 = vadd.f32 %v678_v31, %v607_v0  ;;  %v857_v33 = vpop.f32.mrb[5].mxu1 }
 0x3cf   : > { %682 = vst [vmem:[%s312_s23] sm:$0x1] %v679_v32 }
 0x3d0   : > { %1026 = shalt.err (!%p1023_p7)
}
 0x3d1   : > { %s1027_s22 = scalar_lea.hbm %s1337_s10, 16  ;;  %s1031_s19 = scalar_lea.hbm %s1387_s8, 32 }
 0x3d2   : > { %p1028_p8 = scmp.ne.s32.totalorder %s1337_s10, %s1027_s22  ;;  %p1032_p1 = scmp.lt.u32.totalorder %s1337_s10, %s1387_s8 }
 0x3d3   : > { %p1033_p0 = scmp.lt.u32.totalorder %s1031_s19, %s1027_s22  ;;  %p1035_p6 = scmp.lt.u32.totalorder %s1027_s22, %s1337_s10 }
 0x3d4   : > { %p1029_p11 = pnand %p1028_p8, %p1398_p9 }
 0x3d5   : > { %p1034_p5 = por %p1033_p0, %p1032_p1 }
 0x3d6   : > { %p1030_p13 = pneg %p1029_p11 }
 0x3d7   : > { %p1036_p10 = por %p1035_p6, %p1034_p5 }
 0x3d9   : > { %p1037_p12 = pnand %p1036_p10, %p1030_p13 }
 0x3db   : > { %1040 = shalt.err (!%p1037_p12)
}
 0x3dc   : > { %934 = dma.vmem_to_hbm [thread:$0]  (%p1398_p9), %s1339_s24, 16, %s1337_s10, %s684_s12  }
 0x3dd PF: > { %p946_p2 = scmp.ge.s32.totalorder %s1079_s30, 2  ;;  %s708_s26 = sand.u32 1, %s1067_s27  }
 0x3de   : > { %p1399_p3 = scmp.ne.s32.totalorder %s1392_s16, 0  ;;  %s709_s13 = scalar_lea.sflag [#allocation4], %s708_s26 }
 0x3e0   : > { %p941_p4 = pnand %p946_p2, %p1399_p3 }
 0x3e2   : > { %1062 = dma.done.wait (!%p941_p4), %s709_s13, 16  }
 0x3e3   : > { %1064 = vsyncadd (!%p941_p4), %s709_s13, 4294967280  ;;  %p19_p7 = scmp.ge.s32.totalorder %s1158_s11, 4   ;;  %s1400_s27 = smov %s1071_s28 }
 0x3e4   : > { %s1401_s28 = smov %s1075_s29  ;;  %s1402_s29 = smov %s1169_s14 }
 0x3e5   : > { %s1403_s30 = smov %s1158_s11  ;;  %21 = sbr.rel (!%p19_p7) target bundleno = 4 (0x4), region = 92 }
 0x3ec   :  { %713 = vsyncpa [#allocation3], 1 }
 0x3ed   :  { %715 = vsyncpa [#allocation3 + $0x1], 1 }
 0x3ee   :  { %716 = vsyncpa [#allocation4], 1 }
 0x3ef   :  { %718 = vsyncpa [#allocation4 + $0x1], 1 }

</bundles_post_ra>
